<compile_context>
chip_gen: v5e
topology: v5e:2x2
jax: 0.10.0
libtpu: 0.0.40
codegen_flags: <defaults>
</compile_context>

<pallas_src>
import numpy as np
import jax
import jax.numpy as jnp
from jax import lax
from jax.experimental import pallas as pl
from jax.experimental.pallas import tpu as pltpu


# ----------------------------------------------------------------------------
# Filter construction (matches L2pooling.__init__)
# ----------------------------------------------------------------------------
def _separable_taps(filter_size: int = 5) -> np.ndarray:
    """Normalized 1-D factor t such that outer(t, t) == g / g.sum()."""
    a = np.hanning(filter_size)[1:-1]          # [0.5, 1.0, 0.5]
    return (a / a.sum()).astype(np.float64)    # [0.25, 0.5, 0.25]


def make_l2pool_filter(filter_size: int = 5, channels: int = 64,
                       dtype=jnp.float32) -> jnp.ndarray:
    a = np.hanning(filter_size)[1:-1]
    g = a[:, None] * a[None, :]
    g = g / g.sum()
    filt = np.broadcast_to(g[None, None, :, :],
                           (channels, 1, g.shape[0], g.shape[1]))
    return jnp.asarray(filt, dtype=dtype)      # (C, 1, kh, kw) depthwise


# ----------------------------------------------------------------------------
# Pallas kernel
# ----------------------------------------------------------------------------
def _make_kernel(TC, Hh, W, Ho, Wo, taps):
    # Vertical taps baked as compile-time constants (filter_size=5 -> 3 taps).
    w0, w1, w2 = (float(t) for t in taps)

    def kernel(x_ref, s_ref, o_ref, odd_scr):
        # x_ref  : (1, TC, Hh, 2*W)  even input rows on lanes [0:W], odd on [W:2W]
        # s_ref  : (W, Wo)           constant horizontal band matrix (taps+stride+pad)
        # o_ref  : (1, TC, Ho, Wo)   output block (NCHW)
        # odd_scr: (TC, Hh+1, W) f32 scratch used only for the 1-row down-shift
        xb = x_ref[...]                          # one full-block load
        xf = xb[0].astype(jnp.float32)           # (TC, Hh, 2W)
        even_x = xf[:, :, :W]                    # original rows 0, 2, 4, ...
        odd_x = xf[:, :, W:]                     # original rows 1, 3, 5, ...
        even = even_x * even_x                   # square exactly once per element
        odd = odd_x * odd_x

        # Shift the odd rows down by one row through VMEM scratch; row 0 of the
        # scratch is the implicit zero top-padding row (rewritten every step —
        # cheap, and safe under the megacore grid split).
        odd_scr[:, pl.ds(0, 1), :] = jnp.zeros((TC, 1, W), jnp.float32)
        odd_scr[:, pl.ds(1, Hh), :] = odd
        odd_prev = odd_scr[:, pl.ds(0, Ho), :]   # odd[i-1], with zeros at i == 0

        # Vertical 3-tap stride-2 conv (padded rows 2i, 2i+1, 2i+2):
        #   v[c, i, :] = w0*odd[i-1] + w1*even[i] + w2*odd[i]
        v = w1 * even + w2 * odd + w0 * odd_prev             # (TC, Ho, W), VPU FMAs

        # Horizontal 3-tap stride-2 conv + zero W padding, folded into the constant
        # band matrix S: one batched MXU matmul over all TC channels at once.
        acc = jnp.dot(v.reshape(TC * Ho, W), s_ref[...],
                      preferred_element_type=jnp.float32)     # (TC*Ho, Wo)
        out = jnp.sqrt(acc + 1e-12).astype(o_ref.dtype)       # one EUP sqrt stream
        o_ref[...] = out.reshape(1, TC, Ho, Wo)               # one full-block store

    return kernel


# ----------------------------------------------------------------------------
# Channel-tile selection (byte budget + grid-step floor)
# ----------------------------------------------------------------------------
def _pick_tc(C, N, H, W, itemsize):
    per_ch = max(1, H * W * itemsize)
    budget = 2 << 20                               # ~2 MiB input block (HBM roofline)
    cap = min(C, max(1, budget // per_ch))
    # Keep N*(C//TC) >= 4 grid steps when possible (>= 2 minimum): pipelining
    # overlap + balanced v7x megacore split.
    steps_wanted = 4 if N * C >= 4 else (2 if N * C >= 2 else 1)
    tiles_per_batch = -(-steps_wanted // N)        # ceil(steps_wanted / N)
    cap = min(cap, max(1, C // tiles_per_batch))
    return max(d for d in range(1, C + 1) if C % d == 0 and d <= cap)


# ----------------------------------------------------------------------------
# Wrapper
# ----------------------------------------------------------------------------
def l2pooling(x: jnp.ndarray, *, filter_size: int = 5, stride: int = 2
              ) -> jnp.ndarray:
    """x: (N, C, H, W) NCHW. Returns (N, C, Ho, Wo) NCHW."""
    if filter_size != 5 or stride != 2:
        # TODO(synk): general filter_size/stride; DISTS only uses (5, 2).
        raise NotImplementedError("l2pooling kernel supports filter_size=5, stride=2")

    N, C, H, W = x.shape
    pad = (filter_size - 2) // 2                   # 1
    k = filter_size - 2                            # 3
    Ho = (H + 2 * pad - k) // stride + 1
    Wo = (W + 2 * pad - k) // stride + 1
    taps = _separable_taps(filter_size)

    # Odd H: materialize the implicit bottom zero-pad row so H becomes even.
    # (One small pad op only in the odd case; even-H inputs are zero-copy.)
    if H % 2:
        x = jnp.pad(x, ((0, 0), (0, 0), (0, 1), (0, 0)))
        H += 1
    Hh = H // 2
    assert Ho == Hh, (Ho, Hh)

    # Metadata-only reshape (bitcast): even rows -> lanes [0:W], odd -> [W:2W].
    x2 = x.reshape(N, C, Hh, 2 * W)

    itemsize = x.dtype.itemsize
    TC = _pick_tc(C, N, H, W, itemsize)

    # Horizontal taps + stride-2 + zero W-padding folded into a constant band
    # matrix: out[:, j] = sum_kx taps[kx] * v[:, stride*j + kx - pad].
    S_np = np.zeros((W, Wo), dtype=np.float32)
    for j in range(Wo):
        for kx in range(k):
            col = stride * j + kx - pad
            if 0 <= col < W:
                S_np[col, j] += taps[kx]
    S = jnp.asarray(S_np)

    # Explicit scoped-VMEM limit sized from the real working set: raises v5e's
    # 16 MiB default, matches v6e/v7x defaults, stays under v7x's 64 MiB physical.
    in_block = TC * Hh * 2 * W * itemsize
    out_block = TC * Ho * Wo * itemsize
    scr_bytes = TC * (Hh + 1) * W * 4
    work_f32 = 6 * TC * Ho * W * 4                 # xsq/even/odd/v/matmul temporaries
    est = 2 * in_block + 2 * out_block + scr_bytes + work_f32 + 2 * W * Wo * 4
    vmem_limit = int(min(48 << 20, max(32 << 20, 2 * est)))

    cost = pl.CostEstimate(
        flops=int(N * C * (H * W + 5 * Ho * W + 2 * Ho * W * Wo + Ho * Wo)),
        transcendentals=int(N * C * Ho * Wo),
        bytes_accessed=int(N * C * H * W * itemsize
                           + N * C * Ho * Wo * itemsize + W * Wo * 4),
    )

    kernel = _make_kernel(TC, Hh, W, Ho, Wo, taps)

    out = pl.pallas_call(
        kernel,
        out_shape=jax.ShapeDtypeStruct((N, C, Ho, Wo), x.dtype),
        grid=(N, C // TC),
        in_specs=[
            pl.BlockSpec((1, TC, Hh, 2 * W), lambda n, ct: (n, ct, 0, 0)),
            pl.BlockSpec((W, Wo), lambda n, ct: (0, 0)),
        ],
        out_specs=pl.BlockSpec((1, TC, Ho, Wo), lambda n, ct: (n, ct, 0, 0)),
        scratch_shapes=[pltpu.VMEM((TC, Hh + 1, W), jnp.float32)],
        compiler_params=pltpu.CompilerParams(
            dimension_semantics=("parallel", "parallel"),
            vmem_limit_bytes=vmem_limit),
        cost_estimate=cost,
    )(x2, S)
    return out


# ----------------------------------------------------------------------------
# Pure-JAX reference (for correctness check)
# ----------------------------------------------------------------------------
def l2pooling_ref(x, filter_size=5, stride=2):
    C = x.shape[1]
    padding = (filter_size - 2) // 2
    filt = make_l2pool_filter(filter_size, C, jnp.float32)
    out = lax.conv_general_dilated(
        x.astype(jnp.float32) ** 2, filt,
        window_strides=(stride, stride),
        padding=((padding, padding), (padding, padding)),
        dimension_numbers=("NCHW", "OIHW", "NCHW"),
        feature_group_count=C,
    )
    return jnp.sqrt(out + 1e-12).astype(x.dtype)


if __name__ == "__main__":
    key = jax.random.PRNGKey(0)

    # Primary check: small even shape.
    N, C, H, W = 2, 4, 16, 16
    x = jax.random.normal(key, (N, C, H, W), dtype=jnp.float32)
    out = jax.block_until_ready(l2pooling(x))
    ref = l2pooling_ref(x)
    assert out.shape == (N, C, H // 2, W // 2), out.shape
    np.testing.assert_allclose(np.asarray(out), np.asarray(ref),
                               rtol=1e-5, atol=1e-6)

    # Odd spatial dims (H handled by one internal zero-row pad, W by the band matrix).
    x_odd = jax.random.normal(jax.random.PRNGKey(1), (2, 4, 15, 17),
                              dtype=jnp.float32)
    out2 = jax.block_until_ready(l2pooling(x_odd))
    ref2 = l2pooling_ref(x_odd)
    assert out2.shape == ref2.shape, (out2.shape, ref2.shape)
    np.testing.assert_allclose(np.asarray(out2), np.asarray(ref2),
                               rtol=1e-5, atol=1e-6)

    print("KERNEL_OK")
</pallas_src>

<mosaic_0001>
module attributes {stable_mosaic.version = 11 : i64} {
  func.func @kernel(%arg0: i32, %arg1: i32, %arg2: memref<1x2x8x32xf32, #tpu.memory_space<vmem>>, %arg3: memref<16x8xf32, #tpu.memory_space<vmem>>, %arg4: memref<1x2x8x8xf32, #tpu.memory_space<vmem>>, %arg5: memref<2x9x16xf32, #tpu.memory_space<vmem>>) attributes {dimension_semantics = [#tpu.dimension_semantics<parallel>, #tpu.dimension_semantics<parallel>], iteration_bounds = array<i64: 2, 2>, scalar_prefetch = 0 : i64, scratch_operands = 1 : i64, tpu.core_type = #tpu.core_type<tc>, window_params = [{transform_indices = @transform_0, window_bounds = array<i64: 1, 2, 8, 32>}, {pipeline_mode = #tpu.pipeline_mode<synchronous>, transform_indices = @transform_1, window_bounds = array<i64: 16, 8>}, {transform_indices = @transform_2, window_bounds = array<i64: 1, 2, 8, 8>}]} {
    %c0 = arith.constant 0 : index
    %c0_0 = arith.constant 0 : index
    %c0_1 = arith.constant 0 : index
    %c0_2 = arith.constant 0 : index
    %0 = vector.load %arg2[%c0, %c0_0, %c0_1, %c0_2] : memref<1x2x8x32xf32, #tpu.memory_space<vmem>>, vector<1x2x8x32xf32>
    %1 = vector.shape_cast %0 : vector<1x2x8x32xf32> to vector<2x8x32xf32>
    %2 = vector.extract_strided_slice %1 {offsets = [0, 0, 0], sizes = [2, 8, 16], strides = [1, 1, 1]} : vector<2x8x32xf32> to vector<2x8x16xf32>
    %3 = vector.extract_strided_slice %1 {offsets = [0, 0, 16], sizes = [2, 8, 16], strides = [1, 1, 1]} : vector<2x8x32xf32> to vector<2x8x16xf32>
    %4 = arith.mulf %2, %2 : vector<2x8x16xf32>
    %5 = arith.mulf %3, %3 : vector<2x8x16xf32>
    %cst = arith.constant 0.000000e+00 : f32
    %6 = vector.broadcast %cst : f32 to vector<2x1x16xf32>
    %c0_3 = arith.constant 0 : index
    %c0_4 = arith.constant 0 : index
    %c0_5 = arith.constant 0 : index
    %7 = vector.load %arg5[%c0_3, %c0_4, %c0_5] : memref<2x9x16xf32, #tpu.memory_space<vmem>>, vector<2x1x16xf32>
    tpu.vector_store %arg5[%c0_3, %c0_4, %c0_5], %6 {strides = array<i32>} : memref<2x9x16xf32, #tpu.memory_space<vmem>>, vector<2x1x16xf32>,
    %c0_6 = arith.constant 0 : index
    %c1 = arith.constant 1 : index
    %c0_7 = arith.constant 0 : index
    %8 = vector.load %arg5[%c0_6, %c1, %c0_7] : memref<2x9x16xf32, #tpu.memory_space<vmem>>, vector<2x8x16xf32>
    tpu.vector_store %arg5[%c0_6, %c1, %c0_7], %5 {strides = array<i32>} : memref<2x9x16xf32, #tpu.memory_space<vmem>>, vector<2x8x16xf32>,
    %c0_8 = arith.constant 0 : index
    %c0_9 = arith.constant 0 : index
    %c0_10 = arith.constant 0 : index
    %9 = vector.load %arg5[%c0_8, %c0_9, %c0_10] : memref<2x9x16xf32, #tpu.memory_space<vmem>>, vector<2x8x16xf32>
    %cst_11 = arith.constant 5.000000e-01 : f32
    %10 = vector.broadcast %cst_11 : f32 to vector<2x8x16xf32>
    %11 = arith.mulf %10, %4 : vector<2x8x16xf32>
    %cst_12 = arith.constant 2.500000e-01 : f32
    %12 = vector.broadcast %cst_12 : f32 to vector<2x8x16xf32>
    %13 = arith.mulf %12, %5 : vector<2x8x16xf32>
    %14 = arith.addf %11, %13 : vector<2x8x16xf32>
    %cst_13 = arith.constant 2.500000e-01 : f32
    %15 = vector.broadcast %cst_13 : f32 to vector<2x8x16xf32>
    %16 = arith.mulf %15, %9 : vector<2x8x16xf32>
    %17 = arith.addf %14, %16 : vector<2x8x16xf32>
    %18 = vector.shape_cast %17 : vector<2x8x16xf32> to vector<16x16xf32>
    %c0_14 = arith.constant 0 : index
    %c0_15 = arith.constant 0 : index
    %19 = vector.load %arg3[%c0_14, %c0_15] : memref<16x8xf32, #tpu.memory_space<vmem>>, vector<16x8xf32>
    %cst_16 = arith.constant dense<0.000000e+00> : vector<16x8xf32>
    %20 = tpu.matmul %18, %19, %cst_16 {dimension_numbers = #tpu.dot_dimension_numbers<[1], [0], [0], [1], [0, 0, 1, 1], [], []>} : vector<16x16xf32>, vector<16x8xf32>, vector<16x8xf32> -> vector<16x8xf32>
    %cst_17 = arith.constant 9.99999996E-13 : f32
    %21 = vector.broadcast %cst_17 : f32 to vector<16x8xf32>
    %22 = arith.addf %20, %21 : vector<16x8xf32>
    %23 = math.sqrt %22 : vector<16x8xf32>
    %24 = vector.shape_cast %23 : vector<16x8xf32> to vector<1x2x8x8xf32>
    %c0_18 = arith.constant 0 : index
    %c0_19 = arith.constant 0 : index
    %c0_20 = arith.constant 0 : index
    %c0_21 = arith.constant 0 : index
    %25 = vector.load %arg4[%c0_18, %c0_19, %c0_20, %c0_21] : memref<1x2x8x8xf32, #tpu.memory_space<vmem>>, vector<1x2x8x8xf32>
    tpu.vector_store %arg4[%c0_18, %c0_19, %c0_20, %c0_21], %24 {strides = array<i32>} : memref<1x2x8x8xf32, #tpu.memory_space<vmem>>, vector<1x2x8x8xf32>,
    return
  }
  func.func @transform_0(%arg0: i32, %arg1: i32) -> (i32, i32, i32, i32) {
    %c0_i32 = arith.constant 0 : i32
    %c0_i32_0 = arith.constant 0 : i32
    %c0_i32_1 = arith.constant 0 : i32
    return %arg0, %arg1, %c0_i32, %c0_i32_0 : i32, i32, i32, i32
  }
  func.func @transform_1(%arg0: i32, %arg1: i32) -> (i32, i32) {
    %c0_i32 = arith.constant 0 : i32
    %c0_i32_0 = arith.constant 0 : i32
    %c0_i32_1 = arith.constant 0 : i32
    return %c0_i32, %c0_i32_0 : i32, i32
  }
  func.func @transform_2(%arg0: i32, %arg1: i32) -> (i32, i32, i32, i32) {
    %c0_i32 = arith.constant 0 : i32
    %c0_i32_0 = arith.constant 0 : i32
    %c0_i32_1 = arith.constant 0 : i32
    return %arg0, %arg1, %c0_i32, %c0_i32_0 : i32, i32, i32, i32
  }
}

</mosaic_0001>

<bundles_post_ra>
// kernel: tpu_custom_call.1
= control target key start
LH: loop header
LB: loop body
LE: loop exit
PB: predicated region body
PF: predicated region fallthrough
CT: control target
= control target key end

     0   :  { %7 = vsyncpa [#allocation4], 0  ;;  %s806_s0 = inlined_call_operand.hbm [shape: f32[2,4,8,32], index: 0, kind: input, shape index: {}]   ;;  %s807_s1 = inlined_call_operand.vmem [shape: f32[16,8], index: 1, kind: input, shape index: {}]   ;;  %s808_s2 = inlined_call_operand.hbm [shape: f32[2,4,8,8], index: 2, kind: output, shape index: {}]  }
   0x1   :  { %9 = vsyncpa [#allocation4 + $0x1], 0 }
   0x2   :  { %10 = vsyncpa [#allocation5], 0 }
   0x3   :  { %12 = vsyncpa [#allocation5 + $0x1], 0  ;;  %s648_s9 = smov 0   ;;  %s650_s10 = smov 0  }
   0x4   :  { %s652_s11 = smov 0   ;;  %s654_s12 = smov 0  }
   0x5   :  { %s656_s13 = smov 0   ;;  %s658_s14 = smov 0  }
   0x6   :  { %s660_s15 = smov 0   ;;  %s662_s16 = smov 0  }
   0x7 LB: > { %s388_s17 = sadd.s32 4294967295, %s625_s16   ;;  %s389_s18 = sadd.s32 4294967294, %s625_s16   ;;  %s625_s16 = sphi %s662_s16, %s18_s16   ;;  %s621_s15 = sphi %s660_s15, %s825_s15   ;;  %s617_s14 = sphi %s658_s14, %s824_s14   ;;  %s613_s13 = sphi %s656_s13, %s823_s13   ;;  %s609_s12 = sphi %s654_s12, %s822_s12   ;;  %s605_s11 = sphi %s652_s11, %s821_s11   ;;  %s601_s10 = sphi %s650_s10, %s820_s10   ;;  %s597_s9 = sphi %s648_s9, %s819_s9  }
   0x8   : > { %s27_s19 = sadd.s32 1, %s617_s14  ;;  %s30_s20 = sadd.s32 1, %s621_s15 }
   0x9   : > { %p28_p0 = scmp.ge.s32.totalorder %s27_s19, 2  ;;  %s39_s21 = sadd.s32 1, %s605_s11 }
   0xa   : > { %p46_p1 = scmp.ne.s32.totalorder %s605_s11, %s601_s10  ;;  %p47_p2 = scmp.eq.s32.totalorder %s625_s16, 0 }
   0xb   : > { %s827_s19 = smov (%p28_p0, %s27_s19), 0  ;;  %s829_s20 = smov (!%p28_p0, %s30_s20), %s621_s15 }
   0xc   : > { %811 = sst [smem:[#allocation9_spill]] %s827_s19  ;;  %s35_s22 = ssub.s32 %s617_s14, %s827_s19 }
   0xd   : > { %p701_p3 = por %p47_p2, %p46_p1  ;;  %p32_p4 = scmp.ge.s32.totalorder %s829_s20, 2 }
   0xe   : > { %p52_p5 = scmp.ne.s32.totalorder %s601_s10, %s597_s9  ;;  %p53_p6 = scmp.eq.s32.totalorder %s388_s17, 0 }
   0xf   : > { %p99_p7 = scmp.eq.s32.totalorder %s388_s17, 3  ;;  %s831_s20 = smov (%p32_p4, %s829_s20), 0 }
  0x10   : > { %813 = sst [smem:[#allocation10_spill]] %s831_s20  ;;  %p709_p8 = por %p53_p6, %p52_p5 }
  0x11   : > { %p713_p9 = por %p99_p7, %p46_p1  ;;  %s34_s26 = ssub.s32 %s621_s15, %s831_s20 }
  0x12   : > { %p105_p10 = scmp.eq.s32.totalorder %s389_s18, 3  ;;  %s36_s27 = sor.u32 %s35_s22, %s34_s26 }
  0x13   : > { %p37_p11 = scmp.eq.s32.totalorder %s36_s27, 0  ;;  %p421_p13 = scmp.lt.s32.totalorder %s625_s16, 4 }
  0x14   : > { %p719_p12 = por %p105_p10, %p52_p5  ;;  %s128_s29 = sand.u32 1, %s605_s11  }
  0x15   : > { %s726_s30 = scalar_select %p37_p11, %s605_s11, %s39_s21  }
  0x16   : > { %s392_s3 = sshll.u32 %s128_s29, 4  ;;  %s393_s4 = sshll.u32 %s617_s14, 1 }
  0x17   : > { %s394_s5 = sshll.u32 %s621_s15, 2  ;;  %s132_s6 = scalar_lea.vmem [#allocation3], %s392_s3 }
  0x18   : > { %s142_s7 = sshll.u32 %s132_s6, 4  ;;  %s137_s8 = sadd.s32 %s394_s5, %s393_s4  ;;  %s143_s7 = int_to_ptr.vmem [resolvable:$true] %s142_s7 }
  0x19   : > { %s395_s17 = sshll.u32 %s137_s8, 3  ;;  %p414_p0 = pnand %p421_p13, %p701_p3 }
  0x1a   : > { %s139_s26 = scalar_lea.hbm %s806_s0, %s395_s17  ;;  %s129_s21 = scalar_lea.sflag [#allocation4], %s128_s29 }
  0x1b   : > { %s140_s27 = sshll.u32 %s139_s26, 4  ;;  %s627_s20 = smov 128   ;;  %s141_s27 = int_to_ptr.hbm [resolvable:$true] %s140_s27 }
  0x1c   : > { %s628_s19 = smov 8   ;;  %p396_p1 = scmp.ge.s32.totalorder %s625_s16, 1 }
  0x1d   : > { %416 = dma.hbm_to_vmem [thread:$0]  (!%p414_p0), %s141_s27, 256, %s143_s7, %s129_s21, %s627_s20, %s627_s20, %s628_s19  }
  0x1e   : > { %p150_p2 = scmp.lt.s32.totalorder %s625_s16, 5 }
  0x20   : > { %p151_p4 = pnand %p396_p1, %p150_p2 }
  0x21   : > { %s738_s3 = sand.u32 (!%p151_p4), 1, %s601_s10  }
  0x22   : > { %154 = sbr.rel (%p151_p4) target bundleno = 331 (0x14b), region = 28  ;;  %s397_s23 = sshll.u32 (!%p151_p4), %s738_s3, 4 }
  0x23   : > { %s157_s4 = scalar_lea.sflag (!%p151_p4), [#allocation4], %s738_s3  ;;  %s160_s5 = scalar_lea.vmem (!%p151_p4), [#allocation3], %s397_s23 }
  0x27   : > { %588 = dma.done.wait (%p709_p8), %s157_s4, 256  }
  0x28   : > { %590 = vsyncadd (%p709_p8), %s157_s4, 4294967040  ;;  %v184_v0 = vld [vmem:[%s160_s5] sm:$0xff]  ;;  %s629_s19 = smov 112   ;;  %v185_v3 = vld [vmem:[%s160_s5 + $0x8] sm:$0xff]  ;;  %vm188_vm0 = vcmask 122880   ;;  %v630_v6 = vmov 0.0  }
  0x29   : > { %v186_v1 = vmul.f32 %v184_v0, %v184_v0  ;;  %v187_v4 = vmul.f32 %v185_v3, %v185_v3  ;;  %189 = vst.msk [vmem:[#allocation2] sm:$0x1] %vm188_vm0, %v630_v6  ;;  %v223_v7 = vld [vmem:[%s807_s1 + $0x8] sm:$0xff]  ;;  %v222_v8 = vld [vmem:[%s807_s1] sm:$0xff]  ;;  %vm199_vm1 = vcmask 130048   ;;  %s402_s7 = sshll.u32 %s609_s12, 1 }
  0x2a   : > { %190 = vst.msk [vmem:[#allocation2 + $0x10] sm:$0x1] %vm188_vm0, %v630_v6  ;;  %244 = vmatpush.msra.mxu0 %v223_v7  ;;  %407 = vmatpush.msra.mxu1 %v223_v7  ;;  %s403_s8 = sshll.u32 %s613_s13, 2  ;;  %vm277_vm3 = vcmask 64512   ;;  %s181_s13 = scalar_lea.vmem [#allocation6], %s397_s23 }
  0x2b   : > { %193 = vrot.lane.b32.xlu0 %v186_v1, %s629_s19  ;;  %v206_v2 = vmul.f32 0.25, %v186_v1  ;;  %v207_v5 = vmul.f32 0.25, %v187_v4  ;;  %v204_v11 = vmul.f32 0.5, %v186_v1  ;;  %v205_v17 = vmul.f32 0.5, %v187_v4  ;;  %s292_s17 = sadd.s32 %s403_s8, %s402_s7  ;;  %s295_s27 = sshll.u32 %s181_s13, 4  ;;  %s296_s27 = int_to_ptr.vmem [resolvable:$true] %s295_s27 }
  0x2c   : > { %245 = vmatpush.msra.mxu0 %v222_v8  ;;  %408 = vmatpush.msra.mxu1 %v222_v8  ;;  %s404_s18 = sshll.u32 %s292_s17, 3  ;;  %s281_s4 = scalar_lea.sflag [#allocation5], %s738_s3 }
  0x2d   : > { %210 = vrot.lane.b32.xlu1 %v206_v2, %s629_s19  ;;  %s294_s12 = scalar_lea.hbm %s808_s2, %s404_s18  ;;  %s547_s29 = scalar_lea.hbm %s808_s2, 64 }
  0x2e   : > { %s297_s21 = sshll.u32 %s294_s12, 4  ;;  %s298_s21 = int_to_ptr.hbm [resolvable:$true] %s297_s21 }
  0x2f   : > { %s541_s5 = sshra.s32 %s298_s21, 4  ;;  %s542_s5 = int_to_ptr.hbm [resolvable:$true] %s541_s5 }
  0x30   : > { %s543_s23 = scalar_lea.hbm %s542_s5, 16  ;;  %p548_p7 = scmp.lt.s32.totalorder %s542_s5, %s808_s2 }
  0x31   : > { %p544_p3 = scmp.ne.s32.totalorder %s542_s5, %s543_s23  ;;  %p549_p8 = scmp.lt.s32.totalorder %s547_s29, %s543_s23 }
  0x33   : > { %195 = vrot.lane.b32.xlu0 %v187_v4, %s629_s19  ;;  %p545_p5 = pnand %p544_p3, %p713_p9  ;;  %p550_p10 = por %p549_p8, %p548_p7 }
  0x35   : > { %212 = vrot.lane.b32.xlu1 %v207_v5, %s629_s19  ;;  %p546_p6 = pneg %p545_p5 }
  0x37   : > { %p551_p11 = pnand %p550_p10, %p546_p6 }
  0x9d   : > { %v194_v9 = vpop.permute.xlu0 %193 }
  0x9e   : > { %200 = vst.msk [vmem:[#allocation2 + $0x1] sm:$0xff] %vm199_vm1, %v194_v9 }
  0x9f   : > { %v211_v10 = vpop.permute.xlu1 %210 }
  0xa0   : > { %v216_v12 = vadd.f32 %v211_v10, %v204_v11 }
  0xa5   : > { %v196_v13 = vpop.permute.xlu0 %195  ;;  %v202_v14 = vld [vmem:[#allocation2] sm:$0xff] }
  0xa6   : > { %201 = vst.msk [vmem:[#allocation2 + $0x11] sm:$0xff] %vm199_vm1, %v196_v13  ;;  %v218_v15 = vmul.f32 0.25, %v202_v14 }
  0xa7   : > { %v213_v18 = vpop.permute.xlu1 %212 }
  0xa8   : > { %v220_v16 = vadd.f32 %v218_v15, %v216_v12  ;;  %v217_v19 = vadd.f32 %v213_v18, %v205_v17 }
  0xaa   : > { %399 = vmatmul.msk.f32.vlgmr.msra.gmra.mxu0 %vm199_vm1, %v220_v16 }
  0xad   : > { %v203_v20 = vld [vmem:[#allocation2 + $0x10] sm:$0xff] }
  0xae   : > { %v219_v21 = vmul.f32 0.25, %v203_v20 }
  0xb0   : > { %v221_v22 = vadd.f32 %v219_v21, %v217_v19 }
  0xb2   : > { %400 = vmatmul.msk.f32.vlgmr.msra.gmra.mxu1 %vm199_vm1, %v221_v22 }
 0x127   : > { %v247_v23 = vpop.f32.mrf.mxu0 }
 0x128   : > { %v248_v24 = vadd.f32 1e-12, %v247_v23 }
 0x12a   : > { %493 = vrsqrt.f32 %v248_v24  ;;  %vm260_vm2 = vcmp.eq.f32.partialorder %v248_v24, inf  ;;  %v263_v37 = vand.u32 2147483648, %v248_v24  ;;  %vm262_vm4 = vcmp.eq.f32.partialorder %v248_v24, 0.0 }
 0x12f   : > { %v250_v25 = vpop.f32.mrf.mxu1 }
 0x130   : > { %v494_v26 = vpop.eup %493  ;;  %v251_v27 = vadd.f32 1e-12, %v250_v25 }
 0x131   : > { %v254_v28 = vmul.f32 %v494_v26, %v248_v24 }
 0x132   : > { %495 = vrsqrt.f32 %v251_v27  ;;  %vm272_vm5 = vcmp.eq.f32.partialorder %v251_v27, inf  ;;  %v275_v44 = vand.u32 2147483648, %v251_v27  ;;  %vm274_vm6 = vcmp.eq.f32.partialorder %v251_v27, 0.0 }
 0x133   : > { %v255_v29 = vmul.f32 %v494_v26, %v254_v28 }
 0x135   : > { %v256_v30 = vmul.f32 0.5, %v255_v29 }
 0x137   : > { %v257_v31 = vsub.f32 1.5, %v256_v30 }
 0x138   : > { %v496_v32 = vpop.eup %495 }
 0x139   : > { %v258_v33 = vmul.f32 %v494_v26, %v257_v31  ;;  %v266_v34 = vmul.f32 %v496_v32, %v251_v27 }
 0x13b   : > { %v259_v35 = vmul.f32 %v258_v33, %v248_v24  ;;  %v267_v36 = vmul.f32 %v496_v32, %v266_v34 }
 0x13d   : > { %v268_v38 = vmul.f32 0.5, %v267_v36  ;;  %v261_v39 = vsel %vm260_vm2, %v248_v24, %v259_v35 }
 0x13e   : > { %v264_v40 = vsel %vm262_vm4, %v263_v37, %v261_v39 }
 0x13f   : > { %v269_v41 = vsub.f32 1.5, %v268_v38  ;;  %278 = vst.msk [vmem:[%s181_s13] sm:$0xff] %vm277_vm3, %v264_v40 }
 0x141   : > { %v270_v42 = vmul.f32 %v496_v32, %v269_v41 }
 0x143   : > { %v271_v43 = vmul.f32 %v270_v42, %v251_v27 }
 0x145   : > { %v273_v45 = vsel %vm272_vm5, %v251_v27, %v271_v43 }
 0x146   : > { %v276_v46 = vsel %vm274_vm6, %v275_v44, %v273_v45 }
 0x147   : > { %279 = vst.msk [vmem:[%s181_s13 + $0x8] sm:$0xff] %vm277_vm3, %v276_v46 }
 0x148   : > { %554 = shalt.err (!%p551_p11)
}
 0x149   : > { %s631_s3 = smov 128   ;;  %s632_s7 = smov 8  }
 0x14a   : > { %411 = dma.vmem_to_hbm [thread:$0]  (%p713_p9), %s296_s27, 256, %s298_s21, %s281_s4, %s631_s3, %s631_s3, %s632_s7  }
 0x14b PF: > { %p422_p13 = scmp.ge.s32.totalorder %s625_s16, 2  ;;  %s312_s8 = sand.u32 1, %s597_s9  }
 0x14c   : > { %s313_s17 = scalar_lea.sflag [#allocation5], %s312_s8 }
 0x14d   : > { %p418_p0 = pnand %p422_p13, %p719_p12 }
 0x14f   : > { %p419_p1 = pneg %p418_p0 }
 0x151   : > { %592 = dma.done.wait (%p419_p1), %s313_s17, 256  }
 0x152   : > { %594 = vsyncadd (%p419_p1), %s313_s17, 4294967040  ;;  %s18_s16 = sadd.s32 1, %s625_s16   ;;  %s817_s25 = sld [smem:[#allocation9_spill]] }
 0x153   : > { %p15_p2 = scmp.ge.s32.totalorder %s18_s16, 6   ;;  %s818_s18 = sld [smem:[#allocation10_spill]] }
 0x154   : > { %s819_s9 = smov %s601_s10  ;;  %s820_s10 = smov %s605_s11 }
 0x155   : > { %s821_s11 = smov %s726_s30  ;;  %s822_s12 = smov %s617_s14 }
 0x156   : > { %s823_s13 = smov %s621_s15  ;;  %17 = sbr.rel (!%p15_p2) target bundleno = 7 (0x7), region = 73 }
 0x158   : > { %s824_s14 = smov %s817_s25 }
 0x159   : > { %s825_s15 = smov %s818_s18 }
 0x15b   :  { %319 = vsyncpa [#allocation4], 1 }
 0x15c   :  { %321 = vsyncpa [#allocation4 + $0x1], 1 }
 0x15d   :  { %322 = vsyncpa [#allocation5], 1 }
 0x15e   :  { %324 = vsyncpa [#allocation5 + $0x1], 1 }

</bundles_post_ra>
